<compile_context>
chip_gen: v5e
topology: v5e:2x2
jax: 0.10.0
libtpu: 0.0.40
codegen_flags: <defaults>
</compile_context>

<pallas_src>
import functools
import math

import jax
import jax.numpy as jnp
from jax.experimental import pallas as pl
from jax.experimental.pallas import tpu as pltpu


_NEG_BIG = -1e30  # large-negative mask value (finite: avoids inf-inf -> NaN)


def _default_vmem_limit():
    """Per-generation scoped-VMEM limit: ~75% of physical VMEM."""
    try:
        info = pltpu.get_tpu_info()
        cap = int(getattr(info, "vmem_capacity_bytes", 0) or 0)
        if cap > 0:
            return cap * 3 // 4
    except Exception:
        pass  # capability probe only; fall back to a conservative default
    return 64 * 1024 * 1024


_VMEM_LIMIT_BYTES = _default_vmem_limit()


def _pick_tile(dim, candidates):
    """Tile for an axis where partial tiles are safe (rows / output cols)."""
    for t in candidates:
        if dim >= t and dim % t == 0:
            return t
    for t in candidates:
        if dim >= t:
            return t
    return dim  # small dim: single full-extent block


def _pick_exact(dim, candidates):
    """Tile for a reduction axis: must divide exactly (no garbage contributions)."""
    for t in candidates:
        if dim >= t and dim % t == 0:
            return t
    return dim


# ----------------------------------------------------------------------------
# Tiled linear: y = x @ w_t + b [+ residual]
#   x: (M, K) f32/bf16 (cast to bf16 in-kernel); w_t: (K, N) bf16; b: (1, N) f32
# ----------------------------------------------------------------------------
def _linear_kernel(*refs, has_residual):
    if has_residual:
        x_ref, w_ref, b_ref, res_ref, o_ref = refs
    else:
        x_ref, w_ref, b_ref, o_ref = refs

    @pl.when(pl.program_id(2) == 0)
    def _():
        init = jnp.broadcast_to(b_ref[...], o_ref.shape)
        if has_residual:
            init = init + res_ref[...]
        o_ref[...] = init

    # Accumulate directly into the resident f32 output block (no scratch copy).
    o_ref[...] += jnp.dot(x_ref[...].astype(jnp.bfloat16), w_ref[...],
                          preferred_element_type=jnp.float32)


def linear(x, w_t, b, residual=None):
    """x: (M, K); w_t: (K, N) bf16; b: (1, N) f32; residual: (M, N) f32 -> (M, N) f32."""
    M, K = x.shape
    N = w_t.shape[1]
    tm = _pick_tile(M, (512, 256))            # >= 16-row tiles for bf16 packing
    tn = _pick_tile(N, (512, 256, 128))
    tk = _pick_exact(K, (512, 256, 128))      # K must tile exactly

    in_specs = [
        pl.BlockSpec((tm, tk), lambda i, j, k: (i, k)),
        pl.BlockSpec((tk, tn), lambda i, j, k: (k, j)),
        pl.BlockSpec((1, tn), lambda i, j, k: (0, j)),
    ]
    args = [x, w_t, b]
    if residual is not None:
        in_specs.append(pl.BlockSpec((tm, tn), lambda i, j, k: (i, j)))
        args.append(residual)

    return pl.pallas_call(
        functools.partial(_linear_kernel, has_residual=residual is not None),
        out_shape=jax.ShapeDtypeStruct((M, N), jnp.float32),
        grid=(pl.cdiv(M, tm), pl.cdiv(N, tn), K // tk),
        in_specs=in_specs,
        out_specs=pl.BlockSpec((tm, tn), lambda i, j, k: (i, j)),
        compiler_params=pltpu.CompilerParams(
            dimension_semantics=("parallel", "parallel", "arbitrary"),
            vmem_limit_bytes=_VMEM_LIMIT_BYTES),
    )(*args)


# ----------------------------------------------------------------------------
# Fused LayerNorm + linear over flattened (bs*l, h) rows (QKV projection).
# N is tiled so the (h, 3h) weight never has to fit VMEM whole (v7x).
# ----------------------------------------------------------------------------
def _ln_linear_kernel(x_ref, g_ref, bln_ref, w_ref, b_ref, o_ref):
    x = x_ref[...]                                             # (tm, K) f32
    mu = jnp.mean(x, axis=-1, keepdims=True)
    var = jnp.maximum(jnp.mean(x * x, axis=-1, keepdims=True) - mu * mu, 0.0)
    nx = (x - mu) * jax.lax.rsqrt(var + 1e-5) * g_ref[...] + bln_ref[...]
    y = jnp.dot(nx.astype(jnp.bfloat16), w_ref[...],
                preferred_element_type=jnp.float32) + b_ref[...]
    o_ref[...] = y.astype(o_ref.dtype)


def ln_linear(x, g, bln, w_t, b, out_dtype=jnp.float32):
    """x: (M, K) f32; g/bln: (1, K) f32; w_t: (K, N) bf16; b: (1, N) f32."""
    M, K = x.shape
    N = w_t.shape[1]
    tm = _pick_tile(M, (512, 256))
    tn = _pick_tile(N, (512, 256, 128))
    return pl.pallas_call(
        _ln_linear_kernel,
        out_shape=jax.ShapeDtypeStruct((M, N), out_dtype),
        grid=(pl.cdiv(M, tm), pl.cdiv(N, tn)),
        in_specs=[
            pl.BlockSpec((tm, K), lambda i, j: (i, 0)),
            pl.BlockSpec((1, K), lambda i, j: (0, 0)),
            pl.BlockSpec((1, K), lambda i, j: (0, 0)),
            pl.BlockSpec((K, tn), lambda i, j: (0, j)),
            pl.BlockSpec((1, tn), lambda i, j: (0, j)),
        ],
        out_specs=pl.BlockSpec((tm, tn), lambda i, j: (i, j)),
        compiler_params=pltpu.CompilerParams(
            dimension_semantics=("parallel", "parallel"),
            vmem_limit_bytes=_VMEM_LIMIT_BYTES),
    )(x, g, bln, w_t, b)


# ----------------------------------------------------------------------------
# Flash-style causal + key-padding masked multi-head attention.
#   qkv: (bs, l, 3h) bf16 fused projection (q | k | v along the lane axis,
#        head-major inside each h chunk -- the PyTorch in_proj layout).
#   pad: (bs, 1, l) f32, 1.0 where the key position is padding.
# Output: (bs, l, h) bf16 context, written lane-dense per (batch, q-tile) block.
# ----------------------------------------------------------------------------
def _attention_kernel(pad_ref, q_ref, kv_ref, o_ref, m_sc, l_sc, acc_sc,
                      *, nh, hd, scale):
    ki = pl.program_id(2)
    h = nh * hd
    tq = q_ref.shape[1]
    tkv = kv_ref.shape[1]

    @pl.when(ki == 0)
    def _():
        m_sc[...] = jnp.full_like(m_sc, _NEG_BIG)
        l_sc[...] = jnp.zeros_like(l_sc)
        acc_sc[...] = jnp.zeros_like(acc_sc)

    pad = pad_ref[0]                                           # (1, tkv) f32
    q_pos = (pl.program_id(1) * tq
             + jax.lax.broadcasted_iota(jnp.int32, (tq, tkv), 0))
    k_pos = ki * tkv + jax.lax.broadcasted_iota(jnp.int32, (tq, tkv), 1)
    disallow = jnp.logical_or(k_pos > q_pos, pad > 0.5)        # (tq, tkv)

    # Static (unrolled) head loop; all slicing/rearrangement stays in VMEM and at
    # production hd (128) every per-head matmul is full MXU-width.
    for n in range(nh):
        qn = q_ref[0, :, n * hd:(n + 1) * hd]                  # (tq, hd) bf16
        kn = kv_ref[0, :, h + n * hd:h + (n + 1) * hd]         # (tkv, hd) bf16
        vn = kv_ref[0, :, 2 * h + n * hd:2 * h + (n + 1) * hd]

        s = jax.lax.dot_general(qn, kn, (((1,), (1,)), ((), ())),
                                preferred_element_type=jnp.float32) * scale
        s = jnp.where(disallow, _NEG_BIG, s)

        m_prev = m_sc[:, n:n + 1]                              # (tq, 1)
        m_new = jnp.maximum(m_prev, jnp.max(s, axis=-1, keepdims=True))
        alpha = jnp.exp(m_prev - m_new)
        p = jnp.where(disallow, 0.0, jnp.exp(s - m_new))       # explicit zeroing

        l_sc[:, n:n + 1] = alpha * l_sc[:, n:n + 1] + jnp.sum(
            p, axis=-1, keepdims=True)
        acc_sc[:, n * hd:(n + 1) * hd] = (
            alpha * acc_sc[:, n * hd:(n + 1) * hd]
            + jnp.dot(p.astype(vn.dtype), vn,
                      preferred_element_type=jnp.float32))
        m_sc[:, n:n + 1] = m_new

    @pl.when(ki == pl.num_programs(2) - 1)
    def _():
        # Per-head normalization; the block itself is lane-dense (tq, h).
        for n in range(nh):
            inv = pl.reciprocal(l_sc[:, n:n + 1], approx=True)  # ~1e-3 rel. err
            o_ref[0, :, n * hd:(n + 1) * hd] = (
                acc_sc[:, n * hd:(n + 1) * hd] * inv).astype(o_ref.dtype)


def masked_attention(qkv, pad, num_heads):
    """qkv: (bs, l, 3h) bf16; pad: (bs, 1, l) f32 -> (bs, l, h) bf16."""
    bs, l, h3 = qkv.shape
    h = h3 // 3
    nh = num_heads
    hd = h // nh

    def seq_tile(n):
        for t in (256, 128):
            if n % t == 0:
                return t
        return n

    tq = seq_tile(l)
    tkv = seq_tile(l)
    kernel = functools.partial(_attention_kernel, nh=nh, hd=hd,
                               scale=1.0 / math.sqrt(hd))
    return pl.pallas_call(
        kernel,
        out_shape=jax.ShapeDtypeStruct((bs, l, h), jnp.bfloat16),
        grid=(bs, l // tq, l // tkv),
        in_specs=[
            pl.BlockSpec((1, 1, tkv), lambda b, qi, ki: (b, 0, ki)),
            pl.BlockSpec((1, tq, h3), lambda b, qi, ki: (b, qi, 0)),   # q role
            pl.BlockSpec((1, tkv, h3), lambda b, qi, ki: (b, ki, 0)),  # k/v role
        ],
        out_specs=pl.BlockSpec((1, tq, h), lambda b, qi, ki: (b, qi, 0)),
        scratch_shapes=[
            pltpu.VMEM((tq, nh), jnp.float32),   # running max  m
            pltpu.VMEM((tq, nh), jnp.float32),   # running sum  l
            pltpu.VMEM((tq, h), jnp.float32),    # running ctx  acc (lane-dense)
        ],
        compiler_params=pltpu.CompilerParams(
            dimension_semantics=("parallel", "parallel", "arbitrary"),
            vmem_limit_bytes=_VMEM_LIMIT_BYTES),
    )(pad, qkv, qkv)


# ----------------------------------------------------------------------------
# Fused LayerNorm -> Linear -> ELU -> Linear -> + residual, 4h-chunked.
# ----------------------------------------------------------------------------
def _ln_mlp_kernel(x_ref, g_ref, bln_ref, w1_ref, b1_ref, w2_ref, b2_ref, o_ref):
    j = pl.program_id(1)
    x = x_ref[...]                                             # (tm, H) f32

    @pl.when(j == 0)
    def _():
        o_ref[...] = x + b2_ref[...]                           # residual + bias2 once

    mu = jnp.mean(x, axis=-1, keepdims=True)
    var = jnp.maximum(jnp.mean(x * x, axis=-1, keepdims=True) - mu * mu, 0.0)
    nx = (x - mu) * jax.lax.rsqrt(var + 1e-5) * g_ref[...] + bln_ref[...]

    h1 = jnp.dot(nx.astype(jnp.bfloat16), w1_ref[...],
                 preferred_element_type=jnp.float32) + b1_ref[...]
    h1 = jnp.where(h1 > 0, h1, jnp.expm1(jnp.minimum(h1, 0.0)))   # ELU(alpha=1)
    o_ref[...] += jnp.dot(h1.astype(jnp.bfloat16), w2_ref[...],
                          preferred_element_type=jnp.float32)


def ln_mlp_residual(x, g, bln, w1_t, b1, w2_t, b2):
    """x: (M, h) f32; w1_t: (h, 4h) bf16; w2_t: (4h, h) bf16; biases (1, N) f32."""
    M, H = x.shape
    H4 = w1_t.shape[1]
    tm = _pick_tile(M, (512, 256))
    t4 = _pick_exact(H4, (512, 256, 128))        # 4h chunk (exact divisor)
    return pl.pallas_call(
        _ln_mlp_kernel,
        out_shape=jax.ShapeDtypeStruct((M, H), jnp.float32),
        grid=(pl.cdiv(M, tm), H4 // t4),
        in_specs=[
            pl.BlockSpec((tm, H), lambda i, j: (i, 0)),
            pl.BlockSpec((1, H), lambda i, j: (0, 0)),
            pl.BlockSpec((1, H), lambda i, j: (0, 0)),
            pl.BlockSpec((H, t4), lambda i, j: (0, j)),
            pl.BlockSpec((1, t4), lambda i, j: (0, j)),
            pl.BlockSpec((t4, H), lambda i, j: (j, 0)),
            pl.BlockSpec((1, H), lambda i, j: (0, 0)),
        ],
        out_specs=pl.BlockSpec((tm, H), lambda i, j: (i, 0)),
        compiler_params=pltpu.CompilerParams(
            dimension_semantics=("parallel", "arbitrary"),
            vmem_limit_bytes=_VMEM_LIMIT_BYTES),
    )(x, g, bln, w1_t, b1, w2_t, b2)


# ----------------------------------------------------------------------------
# One transformer block (pre-LN, matching the reference module)
# ----------------------------------------------------------------------------
def transformer_block(x2d, pad, p, num_heads, bs, l):
    h = x2d.shape[1]

    # LN1 + fused QKV projection (batch folded into M); bf16 output feeds attention.
    qkv = ln_linear(x2d, p["ln1_w"], p["ln1_b"], p["w_qkv_t"], p["b_qkv"],
                    out_dtype=jnp.bfloat16)
    qkv = qkv.reshape(bs, l, 3 * h)                # free reshape, no transpose

    ctx = masked_attention(qkv, pad, num_heads)    # (bs, l, h) bf16, lane-dense

    # Output projection with the residual add fused into its epilogue.
    x2d = linear(ctx.reshape(bs * l, h), p["w_o_t"], p["b_o"], residual=x2d)

    # LN2 + MLP + residual 2 (fused, 4h-chunked).
    return ln_mlp_residual(x2d, p["ln2_w"], p["ln2_b"],
                           p["w1_t"], p["b1"], p["w2_t"], p["b2"])


# ----------------------------------------------------------------------------
# Glue: sinusoidal positional embedding, embedding gather, full forward
# ----------------------------------------------------------------------------
def sinusoidal_pos_emb(max_len, dim):
    half = dim // 2
    freqs = jnp.exp(
        jnp.arange(half, dtype=jnp.float32) * -(math.log(10000.0) / (half - 1)))
    ang = jnp.arange(max_len, dtype=jnp.float32)[:, None] * freqs[None, :]
    return jnp.concatenate([jnp.sin(ang), jnp.cos(ang)], axis=-1)   # (max_len, dim)


def transformer_forward(input_seq, params, num_heads):
    bs, l = input_seq.shape
    h = params["fc_b"].shape[1]
    pad = (input_seq == 0).astype(jnp.float32).reshape(bs, 1, l)

    emb = params["embed_table"][input_seq]          # (bs, l, 768) gather (XLA glue)
    x2d = linear(emb.reshape(bs * l, -1), params["fc_w_t"], params["fc_b"])
    x2d = (x2d.reshape(bs, l, h)
           + params["pos_emb"][None, :l, :]).reshape(bs * l, h)

    for blk in params["blocks"]:
        x2d = transformer_block(x2d, pad, blk, num_heads, bs, l)

    logits = linear(x2d, params["fc_out_w_t"], params["fc_out_b"])
    return logits.reshape(bs, l, -1)


# ----------------------------------------------------------------------------
# Deterministic parameter init (synthetic). Weights are generated in PyTorch
# (out, in) convention, then pre-transposed / pre-cast ONCE.
# ----------------------------------------------------------------------------
def init_params(key, vocab, num_emb, hidden, num_layers, embed_dim=768, max_len=64):
    def dense(k, n_out, n_in):
        kw, kb = jax.random.split(k)
        w = 0.02 * jax.random.normal(kw, (n_out, n_in), jnp.float32)
        b = 0.01 * jax.random.normal(kb, (n_out,), jnp.float32)
        return w, b

    def prep(w, b):
        # (out, in) -> MXU-friendly (in, out) bf16; bias -> lane-major (1, out) f32.
        return w.T.astype(jnp.bfloat16), b.reshape(1, -1)

    def block_params(k):
        k1, k2, k3, k4 = jax.random.split(k, 4)
        w_qkv, b_qkv = prep(*dense(k1, 3 * hidden, hidden))
        w_o, b_o = prep(*dense(k2, hidden, hidden))
        w1, b1 = prep(*dense(k3, 4 * hidden, hidden))
        w2, b2 = prep(*dense(k4, hidden, 4 * hidden))
        ones = jnp.ones((1, hidden), jnp.float32)
        zeros = jnp.zeros((1, hidden), jnp.float32)
        return dict(ln1_w=ones, ln1_b=zeros, w_qkv_t=w_qkv, b_qkv=b_qkv,
                    w_o_t=w_o, b_o=b_o, ln2_w=ones, ln2_b=zeros,
                    w1_t=w1, b1=b1, w2_t=w2, b2=b2)

    ks = jax.random.split(key, 1 + num_layers)
    k_emb, k_fc, k_out = jax.random.split(ks[0], 3)
    embed_table = jax.random.normal(k_emb, (vocab, embed_dim), jnp.float32)
    fc_w_t, fc_b = prep(*dense(k_fc, hidden, embed_dim))
    fc_out_w_t, fc_out_b = prep(*dense(k_out, num_emb, hidden))
    blocks = [block_params(ks[1 + i]) for i in range(num_layers)]
    pos_emb = sinusoidal_pos_emb(max_len, hidden)   # precomputed once
    return dict(embed_table=embed_table, fc_w_t=fc_w_t, fc_b=fc_b,
                pos_emb=pos_emb, blocks=blocks,
                fc_out_w_t=fc_out_w_t, fc_out_b=fc_out_b)


if __name__ == "__main__":
    key = jax.random.PRNGKey(0)
    bs, seq_len = 2, 8
    hidden, num_heads, num_layers = 32, 4, 2
    vocab, num_emb = 20, 50

    pkey, dkey = jax.random.split(key)
    params = init_params(pkey, vocab=vocab, num_emb=num_emb, hidden=hidden,
                         num_layers=num_layers, max_len=seq_len)

    # Deterministic token ids; token 0 is the padding token (trailing pad only,
    # so no query row has every key masked).
    tokens = jax.random.randint(dkey, (bs, seq_len), 1, vocab, dtype=jnp.int32)
    tokens = tokens.at[0, 6:].set(0)
    tokens = tokens.at[1, 7:].set(0)

    out = transformer_forward(tokens, params, num_heads=num_heads)
    out = jax.block_until_ready(out)

    assert out.shape == (bs, seq_len, num_emb)
    assert bool(jnp.all(jnp.isfinite(out)))
    print("KERNEL_OK")
</pallas_src>

<mosaic_0001>
module attributes {stable_mosaic.version = 11 : i64} {
  func.func @_linear_kernel(%arg0: i32, %arg1: i32, %arg2: i32, %arg3: memref<16x256xf32, #tpu.memory_space<vmem>>, %arg4: memref<256x32xbf16, #tpu.memory_space<vmem>>, %arg5: memref<1x32xf32, #tpu.memory_space<vmem>>, %arg6: memref<16x32xf32, #tpu.memory_space<vmem>>) attributes {dimension_semantics = [#tpu.dimension_semantics<parallel>, #tpu.dimension_semantics<parallel>, #tpu.dimension_semantics<arbitrary>], iteration_bounds = array<i64: 1, 1, 3>, scalar_prefetch = 0 : i64, scratch_operands = 0 : i64, tpu.core_type = #tpu.core_type<tc>, window_params = [{transform_indices = @transform_0, window_bounds = array<i64: 16, 256>}, {transform_indices = @transform_1, window_bounds = array<i64: 256, 32>}, {transform_indices = @transform_2, window_bounds = array<i64: 1, 32>}, {transform_indices = @transform_3, window_bounds = array<i64: 16, 32>}]} {
    %c0_i32 = arith.constant 0 : i32
    %0 = arith.cmpi eq, %arg2, %c0_i32 : i32
    %1 = arith.extui %0 : i1 to i32
    %c0_i32_0 = arith.constant 0 : i32
    %2 = arith.cmpi ne, %1, %c0_i32_0 : i32
    scf.if %2 {
      %c0_8 = arith.constant 0 : index
      %c0_9 = arith.constant 0 : index
      %10 = vector.load %arg5[%c0_8, %c0_9] : memref<1x32xf32, #tpu.memory_space<vmem>>, vector<1x32xf32>
      %11 = vector.shape_cast %10 : vector<1x32xf32> to vector<1x32xf32>
      %12 = vector.broadcast %11 : vector<1x32xf32> to vector<16x32xf32>
      %c0_10 = arith.constant 0 : index
      %c0_11 = arith.constant 0 : index
      %13 = vector.load %arg6[%c0_10, %c0_11] : memref<16x32xf32, #tpu.memory_space<vmem>>, vector<16x32xf32>
      tpu.vector_store %arg6[%c0_10, %c0_11], %12 {strides = array<i32>} : memref<16x32xf32, #tpu.memory_space<vmem>>, vector<16x32xf32>,
    } else {
    }
    %c0 = arith.constant 0 : index
    %c0_1 = arith.constant 0 : index
    %3 = vector.load %arg6[%c0, %c0_1] : memref<16x32xf32, #tpu.memory_space<vmem>>, vector<16x32xf32>
    %c0_2 = arith.constant 0 : index
    %c0_3 = arith.constant 0 : index
    %4 = vector.load %arg3[%c0_2, %c0_3] : memref<16x256xf32, #tpu.memory_space<vmem>>, vector<16x256xf32>
    %5 = arith.truncf %4 : vector<16x256xf32> to vector<16x256xbf16>
    %c0_4 = arith.constant 0 : index
    %c0_5 = arith.constant 0 : index
    %6 = vector.load %arg4[%c0_4, %c0_5] : memref<256x32xbf16, #tpu.memory_space<vmem>>, vector<256x32xbf16>
    %cst = arith.constant dense<0.000000e+00> : vector<16x32xf32>
    %7 = tpu.matmul %5, %6, %cst {dimension_numbers = #tpu.dot_dimension_numbers<[1], [0], [0], [1], [0, 0, 1, 1], [], []>} : vector<16x256xbf16>, vector<256x32xbf16>, vector<16x32xf32> -> vector<16x32xf32>
    %8 = arith.addf %3, %7 : vector<16x32xf32>
    %c0_6 = arith.constant 0 : index
    %c0_7 = arith.constant 0 : index
    %9 = vector.load %arg6[%c0_6, %c0_7] : memref<16x32xf32, #tpu.memory_space<vmem>>, vector<16x32xf32>
    tpu.vector_store %arg6[%c0_6, %c0_7], %8 {strides = array<i32>} : memref<16x32xf32, #tpu.memory_space<vmem>>, vector<16x32xf32>,
    return
  }
  func.func @transform_0(%arg0: i32, %arg1: i32, %arg2: i32) -> (i32, i32) {
    %c0_i32 = arith.constant 0 : i32
    return %arg0, %arg2 : i32, i32
  }
  func.func @transform_1(%arg0: i32, %arg1: i32, %arg2: i32) -> (i32, i32) {
    %c0_i32 = arith.constant 0 : i32
    return %arg2, %arg1 : i32, i32
  }
  func.func @transform_2(%arg0: i32, %arg1: i32, %arg2: i32) -> (i32, i32) {
    %c0_i32 = arith.constant 0 : i32
    %c0_i32_0 = arith.constant 0 : i32
    return %c0_i32, %arg1 : i32, i32
  }
  func.func @transform_3(%arg0: i32, %arg1: i32, %arg2: i32) -> (i32, i32) {
    %c0_i32 = arith.constant 0 : i32
    return %arg0, %arg1 : i32, i32
  }
}

</mosaic_0001>

<bundles_post_ra>
// kernel: tpu_custom_call.1
= control target key start
LH: loop header
LB: loop body
LE: loop exit
PB: predicated region body
PF: predicated region fallthrough
CT: control target
= control target key end

     0   :  { %8 = vsyncpa [#allocation4], 0  ;;  %s792_s12 = smov 0   ;;  %s794_s13 = smov 0   ;;  %s891_s0 = inlined_call_operand.vmem [shape: f32[16,768], index: 0, kind: input, shape index: {}]   ;;  %s892_s1 = inlined_call_operand.vmem [shape: bf16[768,32], index: 1, kind: input, shape index: {}]   ;;  %s893_s2 = inlined_call_operand.vmem [shape: f32[1,32], index: 2, kind: input, shape index: {}]   ;;  %s894_s3 = inlined_call_operand.hbm [shape: f32[16,32], index: 3, kind: output, shape index: {}]  }
   0x1   :  { %s796_s14 = smov 0   ;;  %s798_s15 = smov 0  }
   0x2   :  { %s800_s16 = smov 0  }
   0x3 LB: > { %s550_s17 = sadd.s32 4294967295, %s767_s16   ;;  %s26_s18 = sadd.s32 1, %s763_s15  ;;  %s767_s16 = sphi %s800_s16, %s14_s16   ;;  %s763_s15 = sphi %s798_s15, %s898_s15   ;;  %s759_s14 = sphi %s796_s14, %s897_s14   ;;  %s755_s13 = sphi %s794_s13, %s896_s13   ;;  %s751_s12 = sphi %s792_s12, %s895_s12  }
   0x4   : > { %p27_p0 = scmp.ge.s32.totalorder %s26_s18, 3  ;;  %p49_p1 = scmp.ne.s32.totalorder %s755_s13, %s751_s12 }
   0x5   : > { %p50_p2 = scmp.eq.s32.totalorder %s767_s16, 0  ;;  %s42_s20 = sadd.s32 1, %s755_s13 }
   0x6   : > { %s900_s18 = smov (%p27_p0, %s26_s18), 0  ;;  %p553_p5 = scmp.ge.s32.totalorder %s767_s16, 3 }
   0x7   : > { %p51_p3 = por %p50_p2, %p49_p1  ;;  %s38_s19 = ssub.s32 %s763_s15, %s900_s18 }
   0x8   : > { %p40_p4 = scmp.eq.s32.totalorder %s38_s19, 0  ;;  %163 = sbr.rel (%p553_p5) target bundleno = 21 (0x15), region = 20 }
   0xa   : > { %s828_s21 = scalar_select %p40_p4, %s755_s13, %s42_s20  }
   0xd   : > { %166 = sbr.rel (!%p51_p3) target bundleno = 21 (0x15), region = 24  ;;  %s168_s22 = sand.u32 (%p51_p3), 1, %s755_s13  }
   0xe   : > { %s630_s23 = sshll.u32 (%p51_p3), %s763_s15, 4  ;;  %s554_s24 = sshll.u32 (%p51_p3), %s168_s22, 5 }
   0xf   : > { %s176_s27 = scalar_lea.vmem (%p51_p3), %s891_s0, %s630_s23  ;;  %s170_s28 = scalar_lea.vmem (%p51_p3), [#allocation2], %s554_s24 }
  0x10   : > { %v189_v0 = vld [vmem:[%s176_s27] sm:$0xff] (%p51_p3)  ;;  %v191_v1 = vld [vmem:[%s176_s27 + $0x8] sm:$0xff] (%p51_p3)  ;;  %v193_v2 = vld [vmem:[%s176_s27 + $0x30] sm:$0xff] (%p51_p3) }
  0x11   : > { %190 = vst [vmem:[%s170_s28] sm:$0xff] (%p51_p3), %v189_v0  ;;  %v195_v3 = vld [vmem:[%s176_s27 + $0x38] sm:$0xff] (%p51_p3) }
  0x12   : > { %192 = vst [vmem:[%s170_s28 + $0x8] sm:$0xff] %v191_v1 }
  0x13   : > { %194 = vst [vmem:[%s170_s28 + $0x10] sm:$0xff] %v193_v2 }
  0x14   : > { %196 = vst [vmem:[%s170_s28 + $0x18] sm:$0xff] %v195_v3 }
  0x15 PF: > { %p557_p6 = scmp.ge.s32.totalorder %s767_s16, 1  ;;  %p213_p7 = scmp.lt.s32.totalorder %s767_s16, 4 }
  0x17   : > { %p214_p8 = pnand %p557_p6, %p213_p7 }
  0x18   : > { %s220_s29 = sand.u32 (!%p214_p8), 1, %s751_s12   ;;  %s559_s30 = sshll.u32 (!%p214_p8), %s759_s14, 5 }
  0x19   : > { %217 = sbr.rel (%p214_p8) target bundleno = 213 (0xd5), region = 51  ;;  %s558_s4 = sshll.u32 (!%p214_p8), %s220_s29, 5 }
  0x1a   : > { %p252_p9 = scmp.lt.s32.totalorder (!%p214_p8), %s559_s30, 95  ;;  %s845_s9 = scalar_lea.vmem (!%p214_p8), [#allocation2], %s558_s4 }
  0x1b   : > { %p561_p10 = scmp.ne.s32.totalorder (!%p214_p8), %s759_s14, 0 }
  0x1e   : > { %s902_s30 = smov (!%p252_p9, %s559_s30), 95  ;;  %267 = sbr.rel (%p561_p10) target bundleno = 38 (0x26), region = 59 }
  0x1f   : > { %s560_s5 = sshll.u32 %s902_s30, 2 }
  0x20   : > { %s843_s8 = scalar_lea.vmem %s892_s1, %s560_s5 }
  0x23   : > { %v696_v4 = vld [vmem:[%s893_s2] ss:$0 sm:$0xff]  ;;  %vm272_vm0 = vcmask 261120  }
  0x24   : > { %273 = vst.msk [vmem:[#allocation3] sm:$0xff] %vm272_vm0, %v696_v4 }
  0x25   : > { %274 = vst.msk [vmem:[#allocation3 + $0x8] sm:$0xff] %vm272_vm0, %v696_v4 }
  0x26 PF: > { %v638_v5 = vld [vmem:[%s843_s8 + $0x38] sm:$0xff]  ;;  %v637_v7 = vld [vmem:[%s843_s8 + $0x30] sm:$0xff]  ;;  %v636_v9 = vld [vmem:[%s843_s8 + $0x28] sm:$0xff]  ;;  %vm441_vm1 = vcmask 261120   ;;  %s769_s12 = smov [#allocation3]   ;;  %s455_s22 = sshll.u32 %s894_s3, 4  ;;  %s456_s22 = int_to_ptr.hbm [resolvable:$true] %s455_s22 }
  0x27   : > { %v646_v6 = vld [vmem:[%s843_s8 + $0x78] sm:$0xff]  ;;  %411 = vmatpush.bf16.msra.mxu0 %v638_v5  ;;  %v645_v8 = vld [vmem:[%s843_s8 + $0x70] sm:$0xff]  ;;  %v644_v10 = vld [vmem:[%s843_s8 + $0x68] sm:$0xff]  ;;  %s453_s14 = sshll.u32 %s769_s12, 4  ;;  %p651_p11 = scmp.eq.s32.totalorder %s550_s17, 2  ;;  %s454_s14 = int_to_ptr.vmem [resolvable:$true] %s453_s14 }
  0x28   : > { %425 = vmatpush.bf16.msra.mxu1 %v646_v6  ;;  %v635_v11 = vld [vmem:[%s843_s8 + $0x20] sm:$0xff]  ;;  %v634_v13 = vld [vmem:[%s843_s8 + $0x18] sm:$0xff]  ;;  %v633_v15 = vld [vmem:[%s843_s8 + $0x10] sm:$0xff]  ;;  %s770_s23 = smov 128   ;;  %s771_s24 = smov 8  }
  0x29   : > { %v643_v12 = vld [vmem:[%s843_s8 + $0x60] sm:$0xff]  ;;  %v642_v14 = vld [vmem:[%s843_s8 + $0x58] sm:$0xff]  ;;  %v641_v16 = vld [vmem:[%s843_s8 + $0x50] sm:$0xff] }
  0x2a   : > { %v632_v17 = vld [vmem:[%s843_s8 + $0x8] sm:$0xff]  ;;  %v631_v19 = vld [vmem:[%s843_s8] sm:$0xff]  ;;  %v279_v22 = vld [vmem:[%s845_s9 + $0x10] sm:$0xff] }
  0x2b   : > { %412 = vmatpush.bf16.msra.mxu0 %v637_v7  ;;  %v640_v18 = vld [vmem:[%s843_s8 + $0x48] sm:$0xff]  ;;  %v639_v20 = vld [vmem:[%s843_s8 + $0x40] sm:$0xff]  ;;  %v280_v24 = vld [vmem:[%s845_s9 + $0x18] sm:$0xff] }
  0x2c   : > { %426 = vmatpush.bf16.msra.mxu1 %v645_v8  ;;  %v277_v21 = vld [vmem:[%s845_s9] sm:$0xff]  ;;  %v278_v23 = vld [vmem:[%s845_s9 + $0x8] sm:$0xff] }
  0x2d   : > { %v281_v25 = vpack.c.bf16 %v279_v22, %v277_v21  ;;  %v282_v26 = vpack.c.bf16 %v280_v24, %v278_v23  ;;  %v275_v28 = vld [vmem:[#allocation3] sm:$0xff]  ;;  %v276_v33 = vld [vmem:[#allocation3 + $0x8] sm:$0xff] }
  0x2f   : > { %413 = vmatpush.bf16.msra.mxu0 %v636_v9 }
  0x30   : > { %427 = vmatpush.bf16.msra.mxu1 %v644_v10 }
  0x33   : > { %414 = vmatpush.bf16.msra.mxu0 %v635_v11 }
  0x34   : > { %428 = vmatpush.bf16.msra.mxu1 %v643_v12 }
  0x37   : > { %415 = vmatpush.bf16.msra.mxu0 %v634_v13 }
  0x38   : > { %429 = vmatpush.bf16.msra.mxu1 %v642_v14 }
  0x3b   : > { %416 = vmatpush.bf16.msra.mxu0 %v633_v15 }
  0x3c   : > { %430 = vmatpush.bf16.msra.mxu1 %v641_v16 }
  0x3f   : > { %417 = vmatpush.bf16.msra.mxu0 %v632_v17 }
  0x40   : > { %431 = vmatpush.bf16.msra.mxu1 %v640_v18 }
  0x43   : > { %418 = vmatpush.bf16.msra.mxu0 %v631_v19 }
  0x44   : > { %432 = vmatpush.bf16.msra.mxu1 %v639_v20 }
  0x46   : > { %419 = vmatmul.bf16.vlgmr.msra.gmra.mxu0 %v281_v25 }
  0x47   : > { %433 = vmatmul.bf16.vlgmr.msra.gmra.mxu1 %v282_v26 }
  0xc3   : > { %v420_v27 = vpop.f32.mrf.mxu0 }
  0xc4   : > { %v434_v29 = vpop.f32.mrf.mxu1 }
  0xc5   : > { %v435_v30 = vadd.f32 %v434_v29, %v420_v27 }
  0xc7   : > { %v439_v31 = vadd.f32 %v435_v30, %v275_v28 }
  0xc9   : > { %442 = vst.msk [vmem:[#allocation3] sm:$0xff] %vm441_vm1, %v439_v31 }
  0xcb   : > { %v422_v32 = vpop.f32.mrf.mxu0 }
  0xcc   : > { %v436_v34 = vpop.f32.mrf.mxu1 }
  0xcd   : > { %v437_v35 = vadd.f32 %v436_v34, %v422_v32 }
  0xcf   : > { %v440_v36 = vadd.f32 %v437_v35, %v276_v33 }
  0xd1   : > { %443 = vst.msk [vmem:[#allocation3 + $0x8] sm:$0xff] %vm441_vm1, %v440_v36 }
  0xd2   : > { %648 = dma.vmem_to_hbm [thread:$0]  (%p651_p11), %s454_s14, 256, %s456_s22, [#allocation4], %s770_s23, %s770_s23, %s771_s24  }
  0xd3   : > { %746 = dma.done.wait (%p651_p11), [#allocation4], 256  }
  0xd4   : > { %748 = vsyncadd (%p651_p11), [#allocation4], 4294967040 }
  0xd5 PF: > { %s14_s16 = sadd.s32 1, %s767_s16   ;;  %s895_s12 = smov %s755_s13 }
  0xd6   : > { %p11_p12 = scmp.ge.s32.totalorder %s14_s16, 5   ;;  %s896_s13 = smov %s828_s21 }
  0xd7   : > { %s897_s14 = smov %s763_s15  ;;  %s898_s15 = smov %s900_s18 }
  0xd8   :  { %13 = sbr.rel (!%p11_p12) target bundleno = 3 (0x3), region = 98 }
  0xdd   :  { %472 = vsyncpa [#allocation4], 1 }
  0xde   :  { %474 = vsyncpa [#allocation4 + $0x1], 1 }

</bundles_post_ra>
